<compile_context>
chip_gen: v7x
topology: tpu7x:2x2x1
jax: 0.10.0
libtpu: 0.0.40
codegen_flags: <defaults>
</compile_context>

<pallas_src>
import functools

import jax
import jax.numpy as jnp
from jax.experimental import pallas as pl
from jax.experimental.pallas import tpu as pltpu


def _row_mask(block_rows, total_rows):
    """(block_rows, 1) bool mask: True for rows inside the real batch."""
    i = pl.program_id(0)
    rows = jax.lax.broadcasted_iota(jnp.int32, (block_rows, 1), 0)
    return rows < (total_rows - i * block_rows)


def _mae_kernel_smooth(logits_ref, labels_ref, out_ref, *, conf, off,
                       block_rows, total_rows, ragged):
    # logits_ref: (block_rows, C) native dtype; labels_ref: (block_rows, 1) int32
    x = logits_ref[...].astype(jnp.float32)
    lbl = labels_ref[...]

    if ragged:
        valid = _row_mask(block_rows, total_rows)
        x = jnp.where(valid, x, 0.0)          # also scrubs undefined OOB rows

    # numerically stable softmax along the class (lane) axis
    m = jnp.max(x, axis=1, keepdims=True)
    ex = jnp.exp(x - m)
    se = jnp.sum(ex, axis=1, keepdims=True)
    probs = ex * pl.reciprocal(se, approx=False)   # exact for 1e-5 tolerance

    # (smoothed) one-hot built in-register -- no [B, C] HBM stream
    cls = jax.lax.broadcasted_iota(jnp.int32, x.shape, 1)
    tgt = jnp.where(cls == lbl, jnp.float32(conf), jnp.float32(off))

    diff = jnp.abs(probs - tgt)
    if ragged:
        diff = jnp.where(valid, diff, 0.0)

    # per-class partial sum; final scalar reduce happens in JAX
    out_ref[0] = jnp.sum(diff, axis=0, keepdims=True)          # (1, C)


def _mae_kernel_onehot(logits_ref, labels_ref, out_ref, *, block_rows,
                       total_rows, ragged):
    # smoothing == 0 fast path: sum_c |p_c - onehot_c| = 2 * (1 - p_target)
    x = logits_ref[...].astype(jnp.float32)
    lbl = labels_ref[...]

    if ragged:
        valid = _row_mask(block_rows, total_rows)
        x = jnp.where(valid, x, 0.0)

    m = jnp.max(x, axis=1, keepdims=True)
    ex = jnp.exp(x - m)
    se = jnp.sum(ex, axis=1, keepdims=True)

    cls = jax.lax.broadcasted_iota(jnp.int32, x.shape, 1)
    ex_t = jnp.sum(jnp.where(cls == lbl, ex, 0.0), axis=1, keepdims=True)
    p_t = ex_t * pl.reciprocal(se, approx=False)

    row_loss = 2.0 * (1.0 - p_t)                                # (block_rows, 1)
    if ragged:
        row_loss = jnp.where(valid, row_loss, 0.0)

    out_ref[0] = jnp.sum(row_loss, axis=0, keepdims=True)       # (1, 1)


def mae_loss(logits, targets, label_smoothing=0.0, block_rows=None):
    """MAE loss matching the PyTorch MAELoss.forward."""
    B, C = logits.shape
    assert 0.0 <= label_smoothing < 1.0
    conf = 1.0 - label_smoothing
    off = (label_smoothing / (C - 1)) if label_smoothing > 0.0 else 0.0

    itemsize = jnp.dtype(logits.dtype).itemsize
    sub = 16 if itemsize <= 2 else 8              # bf16 sublane packing

    # --- VMEM-footprint-aware tile sizing (per review) -----------------------
    padded_c = ((C + 127) // 128) * 128           # lane padding in VMEM
    logits_row = padded_c * itemsize              # bytes/row, logits tile
    labels_row = 128 * 4                          # (rows,1) int32 lane-padded
    temps_row = 4 * padded_c * 4                  # ~4 f32 temporaries per tile
    per_row_vmem = 2 * (logits_row + labels_row) + temps_row   # double-buffered

    if block_rows is None:
        budget = 32 * 1024 * 1024                 # working-set target (all gens)
        block_rows = max(sub, budget // per_row_vmem)
    block_rows = min(block_rows, B)
    if block_rows < B:                            # must be sublane-aligned unless full B
        block_rows = max(sub, (block_rows // sub) * sub)

    num_blocks = pl.cdiv(B, block_rows)
    ragged = (B % block_rows) != 0                # last block handled by in-kernel mask

    vmem_limit = per_row_vmem * block_rows + 8 * 1024 * 1024
    vmem_limit = int(min(max(vmem_limit, 16 * 1024 * 1024), 56 * 1024 * 1024))
    # --------------------------------------------------------------------------

    labels = targets.astype(jnp.int32).reshape(B, 1)

    if label_smoothing > 0.0:
        kernel = functools.partial(
            _mae_kernel_smooth, conf=float(conf), off=float(off),
            block_rows=block_rows, total_rows=B, ragged=ragged)
        out_shape = jax.ShapeDtypeStruct((num_blocks, 1, C), jnp.float32)
        out_spec = pl.BlockSpec((1, 1, C), lambda i: (i, 0, 0))
    else:
        kernel = functools.partial(
            _mae_kernel_onehot,
            block_rows=block_rows, total_rows=B, ragged=ragged)
        out_shape = jax.ShapeDtypeStruct((num_blocks, 1, 1), jnp.float32)
        out_spec = pl.BlockSpec((1, 1, 1), lambda i: (i, 0, 0))

    partials = pl.pallas_call(
        kernel,
        out_shape=out_shape,
        grid_spec=pltpu.PrefetchScalarGridSpec(
            num_scalar_prefetch=0,
            grid=(num_blocks,),
            in_specs=[
                pl.BlockSpec((block_rows, C), lambda i: (i, 0)),
                pl.BlockSpec((block_rows, 1), lambda i: (i, 0)),
            ],
            out_specs=out_spec,
        ),
        compiler_params=pltpu.CompilerParams(
            dimension_semantics=("parallel",),    # independent batch blocks
            vmem_limit_bytes=vmem_limit,
        ),
    )(logits, labels)

    return jnp.sum(partials) / jnp.float32(B * C)


def _mae_loss_ref(logits, targets, label_smoothing=0.0):
    """Pure-JAX reference mirroring the PyTorch MAELoss module."""
    B, C = logits.shape
    probs = jax.nn.softmax(logits.astype(jnp.float32), axis=1)
    if label_smoothing > 0.0:
        one_hot = jnp.full((B, C), label_smoothing / (C - 1), dtype=jnp.float32)
        one_hot = one_hot.at[jnp.arange(B), targets].set(1.0 - label_smoothing)
    else:
        one_hot = jax.nn.one_hot(targets, C, dtype=jnp.float32)
    return jnp.mean(jnp.abs(probs - one_hot))


if __name__ == "__main__":
    key = jax.random.PRNGKey(0)
    k1, k2, k3, k4 = jax.random.split(key, 4)

    B, C = 16, 10            # batch, num_classes
    logits = jax.random.normal(k1, (B, C), dtype=jnp.float32)
    targets = jax.random.randint(k2, (B,), 0, C, dtype=jnp.int32)

    # smoothed-label path
    loss = jax.block_until_ready(mae_loss(logits, targets, label_smoothing=0.1))
    ref = _mae_loss_ref(logits, targets, label_smoothing=0.1)
    assert jnp.allclose(loss, ref, rtol=1e-5, atol=1e-6), (loss, ref)

    # plain one-hot path (fast path: 2 * (1 - p_target))
    loss0 = jax.block_until_ready(mae_loss(logits, targets, label_smoothing=0.0))
    ref0 = _mae_loss_ref(logits, targets, label_smoothing=0.0)
    assert jnp.allclose(loss0, ref0, rtol=1e-5, atol=1e-6), (loss0, ref0)

    # bf16 logits path (cast to f32 happens inside the kernel)
    logits_bf16 = logits.astype(jnp.bfloat16)
    loss_bf = jax.block_until_ready(
        mae_loss(logits_bf16, targets, label_smoothing=0.1))
    ref_bf = _mae_loss_ref(logits_bf16, targets, label_smoothing=0.1)
    assert jnp.allclose(loss_bf, ref_bf, rtol=1e-4, atol=1e-5), (loss_bf, ref_bf)

    # ragged batch (B not divisible by block_rows) exercising the masked last block
    Br = 20
    logits_r = jax.random.normal(k3, (Br, C), dtype=jnp.float32)
    targets_r = jax.random.randint(k4, (Br,), 0, C, dtype=jnp.int32)
    loss_r = jax.block_until_ready(
        mae_loss(logits_r, targets_r, label_smoothing=0.1, block_rows=8))
    ref_r = _mae_loss_ref(logits_r, targets_r, label_smoothing=0.1)
    assert jnp.allclose(loss_r, ref_r, rtol=1e-5, atol=1e-6), (loss_r, ref_r)
    loss_r0 = jax.block_until_ready(
        mae_loss(logits_r, targets_r, label_smoothing=0.0, block_rows=8))
    ref_r0 = _mae_loss_ref(logits_r, targets_r, label_smoothing=0.0)
    assert jnp.allclose(loss_r0, ref_r0, rtol=1e-5, atol=1e-6), (loss_r0, ref_r0)

    print("KERNEL_OK")
</pallas_src>

<mosaic_0001>
module attributes {stable_mosaic.version = 11 : i64} {
  func.func @_mae_kernel_smooth(%arg0: i32, %arg1: memref<16x10xf32, #tpu.memory_space<vmem>>, %arg2: memref<16x1xi32, #tpu.memory_space<vmem>>, %arg3: memref<1x1x10xf32, #tpu.memory_space<vmem>>) attributes {dimension_semantics = [#tpu.dimension_semantics<parallel>], iteration_bounds = array<i64: 1>, scalar_prefetch = 0 : i64, scratch_operands = 0 : i64, tpu.core_type = #tpu.core_type<tc>, window_params = [{transform_indices = @transform_0, window_bounds = array<i64: 16, 10>}, {transform_indices = @transform_1, window_bounds = array<i64: 16, 1>}, {transform_indices = @transform_2, window_bounds = array<i64: 1, 1, 10>}]} {
    %c0 = arith.constant 0 : index
    %c0_0 = arith.constant 0 : index
    %0 = vector.load %arg1[%c0, %c0_0] : memref<16x10xf32, #tpu.memory_space<vmem>>, vector<16x10xf32>
    %c0_1 = arith.constant 0 : index
    %c0_2 = arith.constant 0 : index
    %1 = vector.load %arg2[%c0_1, %c0_2] : memref<16x1xi32, #tpu.memory_space<vmem>>, vector<16x1xi32>
    %cst = arith.constant dense<0xFF800000> : vector<16xf32>
    %2 = vector.multi_reduction <maximumf>, %0, %cst [1] : vector<16x10xf32> to vector<16xf32>
    %3 = vector.shape_cast %2 : vector<16xf32> to vector<16x1xf32>
    %4 = vector.broadcast %3 : vector<16x1xf32> to vector<16x10xf32>
    %5 = arith.subf %0, %4 : vector<16x10xf32>
    %6 = math.exp %5 : vector<16x10xf32>
    %cst_3 = arith.constant dense<0.000000e+00> : vector<16xf32>
    %7 = vector.multi_reduction <add>, %6, %cst_3 [1] : vector<16x10xf32> to vector<16xf32>
    %8 = vector.shape_cast %7 : vector<16xf32> to vector<16x1xf32>
    %9 = tpu.reciprocal %8 : vector<16x1xf32> -> vector<16x1xf32>
    %10 = vector.broadcast %9 : vector<16x1xf32> to vector<16x10xf32>
    %11 = arith.mulf %6, %10 : vector<16x10xf32>
    %12 = tpu.iota {dimensions = array<i32: 1>} : vector<16x10xi32>
    %13 = vector.broadcast %1 : vector<16x1xi32> to vector<16x10xi32>
    %14 = arith.cmpi eq, %12, %13 : vector<16x10xi32>
    %cst_4 = arith.constant 0.899999976 : f32
    %cst_5 = arith.constant 0.0111111114 : f32
    %15 = vector.broadcast %cst_4 : f32 to vector<16x10xf32>
    %16 = vector.broadcast %cst_5 : f32 to vector<16x10xf32>
    %17 = arith.select %14, %15, %16 : vector<16x10xi1>, vector<16x10xf32>
    %18 = arith.subf %11, %17 : vector<16x10xf32>
    %19 = math.absf %18 : vector<16x10xf32>
    %cst_6 = arith.constant dense<0.000000e+00> : vector<10xf32>
    %20 = vector.multi_reduction <add>, %19, %cst_6 [0] : vector<16x10xf32> to vector<10xf32>
    %21 = vector.shape_cast %20 : vector<10xf32> to vector<1x10xf32>
    %c0_7 = arith.constant 0 : index
    %c0_8 = arith.constant 0 : index
    %c0_9 = arith.constant 0 : index
    %22 = vector.load %arg3[%c0_7, %c0_8, %c0_9] : memref<1x1x10xf32, #tpu.memory_space<vmem>>, vector<1x1x10xf32>
    %23 = vector.shape_cast %22 : vector<1x1x10xf32> to vector<1x10xf32>
    %24 = vector.shape_cast %21 : vector<1x10xf32> to vector<1x1x10xf32>
    tpu.vector_store %arg3[%c0_7, %c0_8, %c0_9], %24 {strides = array<i32>} : memref<1x1x10xf32, #tpu.memory_space<vmem>>, vector<1x1x10xf32>,
    return
  }
  func.func @transform_0(%arg0: i32) -> (i32, i32) {
    %c0_i32 = arith.constant 0 : i32
    %c0_i32_0 = arith.constant 0 : i32
    return %arg0, %c0_i32 : i32, i32
  }
  func.func @transform_1(%arg0: i32) -> (i32, i32) {
    %c0_i32 = arith.constant 0 : i32
    %c0_i32_0 = arith.constant 0 : i32
    return %arg0, %c0_i32 : i32, i32
  }
  func.func @transform_2(%arg0: i32) -> (i32, i32, i32) {
    %c0_i32 = arith.constant 0 : i32
    %c0_i32_0 = arith.constant 0 : i32
    %c0_i32_1 = arith.constant 0 : i32
    return %arg0, %c0_i32, %c0_i32_0 : i32, i32, i32
  }
}

</mosaic_0001>

<bundles_post_ra>
// kernel: tpu_custom_call.1
= control target key start
LH: loop header
LB: loop body
LE: loop exit
PB: predicated region body
PF: predicated region fallthrough
CT: control target
= control target key end

     0   :  { %vm16_vm0 = vcmask 80896   ;;  %s165_s0 = inlined_call_operand.vmem [shape: f32[16,10], index: 0, kind: input, shape index: {}]   ;;  %s166_s1 = inlined_call_operand.vmem [shape: s32[16,1], index: 1, kind: input, shape index: {}]   ;;  %s167_s2 = inlined_call_operand.hbm [shape: f32[1,1,10], index: 2, kind: output, shape index: {}]  }
   0x1   :  { %v12_v0 = vld [vmem:[%s165_s0] sm:$0xff]  ;;  %v13_v1 = vld [vmem:[%s165_s0 + $0x8] sm:$0xff] }
   0x2   :  { %7 = vsyncpa [#allocation3], 0  ;;  %v17_v2 = vsel %vm16_vm0, %v12_v0, -inf  ;;  %v20_v3 = vsel %vm16_vm0, %v13_v1, -inf  ;;  %v14_v4 = vld [vmem:[%s166_s1] sm:$0xff]  ;;  %v117_v5 = vmov 0   ;;  %v39_v18 = vlaneseq }
   0x3   :  { %18 = vmax.xlane.f32.xlu0 %v17_v2  ;;  %84 = vset.pattern.permute.xlu1 %v117_v5  ;;  %v15_v16 = vld [vmem:[%s166_s1 + $0x8] sm:$0xff]  ;;  %v118_v24 = vmov 0.011111111   ;;  %s119_s1 = smov [#allocation2]   ;;  %vm64_vm3 = vcmask 73728  }
   0x4   :  { %83 = vset.pattern.permute.xlu0 %v117_v5  ;;  %v40_v20 = vand.u32 127, %v39_v18  ;;  %s72_s16 = sshll.u32 %s119_s1, 4  ;;  %s73_s16 = int_to_ptr.vmem [resolvable:$true] %s72_s16 }
   0x5   :  { %s93_s17 = scalar_lea.vmem %s73_s16, 16  ;;  %s97_s18 = scalar_lea.vmem %s73_s16, 32 }
   0x6   :  { %p94_p0 = scmp.ne.s32.totalorder %s73_s16, %s93_s17  ;;  %p98_p1 = scmp.lt.s32.totalorder %s73_s16, %s73_s16 }
   0x7   :  { %21 = vmax.xlane.f32.xlu0 %v20_v3  ;;  %p99_p2 = scmp.lt.s32.totalorder %s97_s18, %s93_s17 }
   0x9   :  { %p100_p3 = por %p99_p2, %p98_p1 }
   0xb   :  { %p101_p4 = pnand %p100_p3, %p94_p0 }
  0x1d   :  { %42 = vperm.xlu0 %83, %v14_v4  }
  0x90   :  { %v19_v6 = vpop.xlane.xlu0 %18 }
  0x91   :  { %v23_v7 = vsub.f32 %v12_v0, %v19_v6 }
  0x93   :  { %v25_v8 = vmul.f32 1.442695, %v23_v7 }
  0x94   :  { %v22_v9 = vpop.xlane.xlu0 %21 }
  0x95   :  { %85 = vpow2.f32 %v25_v8  ;;  %v24_v10 = vsub.f32 %v13_v1, %v22_v9 }
  0x97   :  { %v27_v11 = vmul.f32 1.442695, %v24_v10 }
  0x99   :  { %87 = vpow2.f32 %v27_v11 }
  0x9c   :  { %v43_v21 = vpop.permute.xlu0 %42 }
  0x9d   :  { %vm47_vm1 = vcmp.eq.s32.totalorder %v40_v20, %v43_v21 }
  0x9e   :  { %v49_v25 = vsel %vm47_vm1, 0.9, %v118_v24 }
  0x9f   :  { %v86_v12 = vpop.eup %85 }
  0xa0   :  { %v29_v13 = vsel %vm16_vm0, %v86_v12, 0.0 }
  0xa1   :  { %30 = vadd.xlane.f32.xlu1 %v29_v13 }
  0xa3   :  { %v88_v14 = vpop.eup %87 }
  0xa4   :  { %v32_v15 = vsel %vm16_vm0, %v88_v14, 0.0 }
  0xa5   :  { %33 = vadd.xlane.f32.xlu1 %v32_v15 }
  0xb6   :  { %45 = vperm.xlu1 %84, %v15_v16  }
 0x12e   :  { %v31_v17 = vpop.xlane.xlu1 %30 }
 0x12f   :  { %89 = vrcp.f32 %v31_v17 }
 0x132   :  { %v34_v19 = vpop.xlane.xlu1 %33 }
 0x133   :  { %91 = vrcp.f32 %v34_v19 }
 0x136   :  { %v46_v22 = vpop.permute.xlu1 %45 }
 0x137   :  { %vm48_vm2 = vcmp.eq.s32.totalorder %v40_v20, %v46_v22 }
 0x138   :  { %v50_v29 = vsel %vm48_vm2, 0.9, %v118_v24 }
 0x139   :  { %v90_v23 = vpop.eup %89 }
 0x13a   :  { %v37_v26 = vmul.f32 %v90_v23, %v86_v12 }
 0x13c   :  { %v51_v27 = vsub.f32 %v37_v26, %v49_v25 }
 0x13d   :  { %v92_v28 = vpop.eup %91 }
 0x13e   :  { %v38_v30 = vmul.f32 %v92_v28, %v88_v14  ;;  %v53_v31 = vand.u32 2147483647, %v51_v27 }
 0x140   :  { %v52_v32 = vsub.f32 %v38_v30, %v50_v29  ;;  %v55_v34 = vsel %vm16_vm0, %v53_v31, 0.0 }
 0x142   :  { %v54_v33 = vand.u32 2147483647, %v52_v32 }
 0x144   :  { %v56_v35 = vsel %vm16_vm0, %v54_v33, 0.0 }
 0x145   :  { %v57_v36 = vadd.f32 %v56_v35, %v55_v34 }
 0x147   :  { %v58_v37 = vrot.slane %v57_v36, 4 }
 0x149   :  { %v59_v38 = vadd.f32 %v58_v37, %v57_v36 }
 0x14b   :  { %v60_v39 = vrot.slane %v59_v38, 2 }
 0x14d   :  { %v61_v40 = vadd.f32 %v60_v39, %v59_v38 }
 0x14f   :  { %v62_v41 = vrot.slane %v61_v40, 1 }
 0x151   :  { %v63_v42 = vadd.f32 %v62_v41, %v61_v40 }
 0x153   :  { %65 = vst.msk [vmem:[#allocation2] sm:$0x1] %vm64_vm3, %v63_v42 }
 0x154   :  { %104 = shalt.err (!%p101_p4)
}
 0x155   :  { %s105_s21 = scalar_lea.hbm %s167_s2, 16 }
 0x156   :  { %p106_p5 = scmp.ne.s32.totalorder %s167_s2, %s105_s21  ;;  %p109_p6 = scmp.lt.u32.totalorder %s105_s21, %s167_s2 }
 0x158   :  { %p111_p7 = pnand %p109_p6, %p106_p5 }
 0x15a   :  { %114 = shalt.err (!%p111_p7)
}
 0x15b   :  { %75 = dma.vmem_to_hbm [thread:$0]  %s73_s16, 16, %s167_s2, [#allocation3]  }
 0x15c   :  { %115 = dma.done.wait [#allocation3], 16  }
 0x15d   :  { %116 = vsyncadd [#allocation3], 4294967280 }
 0x15e   :  { %79 = vsyncpa [#allocation3], 1 }

</bundles_post_ra>
